<compile_context>
chip_gen: v7x
topology: tpu7x:2x2x1
jax: 0.10.0
libtpu: 0.0.40
codegen_flags: <defaults>
</compile_context>

<pallas_src>
import jax
import jax.numpy as jnp
from jax.experimental import pallas as pl
from jax.experimental.pallas import tpu as pltpu

# Model hyper-parameters (match the PyTorch defaults).
INPUT_SIZE = 2
Z_DIM = 2
H_DIM = [32, 32]
HIDDEN = H_DIM[0]            # all hidden widths are 32
NUM_FUSED_LAYERS = 5         # enc1, enc2, (enc3 @ dec1) fused, dec2, dec3

BATCH = 64
BATCH_TILE = BATCH           # whole batch in one grid step (grid == (1,))


def autoencoder_kernel(x_ref, w_ref, b_ref, out_ref):
    """x_ref: (TB, 32) zero-padded input; w_ref: (5, 32, 32); b_ref: (5, 1, 32);
    out_ref: (TB, 32) -- real outputs live in the first INPUT_SIZE lanes."""
    h = x_ref[...]                                                   # (TB, 32)

    # Layers 0..3: Linear + ReLU.  Layer 0's padded weight rows are zero, so the
    # zero-padded input columns contribute nothing (exact).
    for k in range(NUM_FUSED_LAYERS - 1):
        h = jnp.dot(h, w_ref[k], preferred_element_type=jnp.float32) + b_ref[k]
        h = jnp.maximum(h, 0.0)

    # Layer 4 (dec3): no ReLU.  Padded cols of W[4]/B[4] are zero; store the full
    # 32-lane tile (lane-dense, unmasked vst) and let the wrapper slice [:, :2].
    y = jnp.dot(h, w_ref[4], preferred_element_type=jnp.float32) + b_ref[4]
    out_ref[...] = y.astype(out_ref.dtype)


def init_linear_params(key, in_dim, out_dim):
    """Deterministic init mimicking nn.Linear's uniform(-1/sqrt(in), 1/sqrt(in))."""
    kw, kb = jax.random.split(key)
    bound = 1.0 / jnp.sqrt(jnp.float32(in_dim))
    # PyTorch weight is (out, in); we store the transposed (in, out) for h @ W.
    w_t = jax.random.uniform(kw, (in_dim, out_dim), jnp.float32, -bound, bound)
    b = jax.random.uniform(kb, (1, out_dim), jnp.float32, -bound, bound)
    return w_t, b


def make_raw_params(key):
    """Twelve raw (transposed-weight, bias) tensors for the 6 Linear layers."""
    enc_dims = [INPUT_SIZE] + H_DIM + [Z_DIM]
    dec_dims = [Z_DIM] + H_DIM + [INPUT_SIZE]
    params = []
    keys = jax.random.split(key, len(enc_dims) - 1 + len(dec_dims) - 1)
    ki = 0
    for d0, d1 in zip(enc_dims, enc_dims[1:]):
        params.extend(init_linear_params(keys[ki], d0, d1)); ki += 1
    for d0, d1 in zip(dec_dims, dec_dims[1:]):
        params.extend(init_linear_params(keys[ki], d0, d1)); ki += 1
    return params  # [we1, be1, we2, be2, we3, be3, wd1, bd1, wd2, bd2, wd3, bd3]


def pack_params(raw):
    """Fuse enc3/dec1 and pack everything into two zero-padded slabs."""
    we1, be1, we2, be2, we3, be3, wd1, bd1, wd2, bd2, wd3, bd3 = raw
    w_fused = we3 @ wd1                      # (32, 32)  -- exact, no ReLU between
    b_fused = be3 @ wd1 + bd1                # (1, 32)

    W = jnp.zeros((NUM_FUSED_LAYERS, HIDDEN, HIDDEN), jnp.float32)
    W = W.at[0, :INPUT_SIZE, :].set(we1)     # (2, 32) in padded rows
    W = W.at[1].set(we2)
    W = W.at[2].set(w_fused)
    W = W.at[3].set(wd2)
    W = W.at[4, :, :INPUT_SIZE].set(wd3)     # (32, 2) in padded cols

    B = jnp.zeros((NUM_FUSED_LAYERS, 1, HIDDEN), jnp.float32)
    B = B.at[0].set(be1)
    B = B.at[1].set(be2)
    B = B.at[2].set(b_fused)
    B = B.at[3].set(bd2)
    B = B.at[4, 0, :INPUT_SIZE].set(bd3[0])
    return W, B


def autoencoder_forward(x, w_packed, b_packed, batch_tile=BATCH_TILE):
    batch = x.shape[0]
    tb = min(batch_tile, batch)
    grid = (pl.cdiv(batch, tb),)

    # Zero-pad x to the hidden width so layer 0 uses the full (32,32) weight tile
    # (padded rows of W[0] are zero => bit-identical result).
    x_pad = jnp.zeros((batch, HIDDEN), x.dtype).at[:, :INPUT_SIZE].set(x)

    y = pl.pallas_call(
        autoencoder_kernel,
        out_shape=jax.ShapeDtypeStruct((batch, HIDDEN), jnp.float32),
        grid_spec=pltpu.PrefetchScalarGridSpec(
            num_scalar_prefetch=0,
            grid=grid,
            in_specs=[
                # Activations: tiled over batch (single tile at B=64).
                pl.BlockSpec((tb, HIDDEN), lambda i: (i, 0)),
                # Packed weights / biases: full-array blocks, same block index
                # every step -> VMEM-resident.
                pl.BlockSpec((NUM_FUSED_LAYERS, HIDDEN, HIDDEN), lambda i: (0, 0, 0)),
                pl.BlockSpec((NUM_FUSED_LAYERS, 1, HIDDEN), lambda i: (0, 0, 0)),
            ],
            out_specs=pl.BlockSpec((tb, HIDDEN), lambda i: (i, 0)),
        ),
        compiler_params=pltpu.CompilerParams(
            # grid=(1,) at this size: no megacore sharding (would duplicate the
            # 20 KiB weight DMA per core for microseconds of work).
            dimension_semantics=("arbitrary",),
        ),
    )(x_pad, w_packed, b_packed)

    # Final narrow slice done in the wrapper (kernel store stays lane-dense).
    return y[:, :INPUT_SIZE]


def autoencoder_ref(x, raw):
    """Pure-JAX reference of the ORIGINAL (unfused, unpacked) 6-layer forward."""
    we1, be1, we2, be2, we3, be3, wd1, bd1, wd2, bd2, wd3, bd3 = raw
    h = jnp.maximum(x @ we1 + be1, 0.0)
    h = jnp.maximum(h @ we2 + be2, 0.0)
    z = h @ we3 + be3
    h = jnp.maximum(z @ wd1 + bd1, 0.0)
    h = jnp.maximum(h @ wd2 + bd2, 0.0)
    return h @ wd3 + bd3


if __name__ == "__main__":
    key = jax.random.PRNGKey(0)
    k_x, k_p = jax.random.split(key)
    x = jax.random.normal(k_x, (BATCH, INPUT_SIZE), jnp.float32)

    raw_params = make_raw_params(k_p)
    w_packed, b_packed = pack_params(raw_params)

    out = autoencoder_forward(x, w_packed, b_packed)
    out = jax.block_until_ready(out)

    ref = autoencoder_ref(x, raw_params)
    assert out.shape == (BATCH, INPUT_SIZE)
    assert jnp.allclose(out, ref, atol=1e-4, rtol=1e-4), "mismatch vs JAX reference"

    print("KERNEL_OK")
</pallas_src>

<mosaic_0001>
module attributes {stable_mosaic.version = 11 : i64} {
  func.func @autoencoder_kernel(%arg0: i32, %arg1: memref<64x32xf32, #tpu.memory_space<vmem>>, %arg2: memref<5x32x32xf32, #tpu.memory_space<vmem>>, %arg3: memref<5x1x32xf32, #tpu.memory_space<vmem>>, %arg4: memref<64x32xf32, #tpu.memory_space<vmem>>) attributes {dimension_semantics = [#tpu.dimension_semantics<arbitrary>], iteration_bounds = array<i64: 1>, scalar_prefetch = 0 : i64, scratch_operands = 0 : i64, tpu.core_type = #tpu.core_type<tc>, window_params = [{transform_indices = @transform_0, window_bounds = array<i64: 64, 32>}, {pipeline_mode = #tpu.pipeline_mode<synchronous>, transform_indices = @transform_1, window_bounds = array<i64: 5, 32, 32>}, {pipeline_mode = #tpu.pipeline_mode<synchronous>, transform_indices = @transform_2, window_bounds = array<i64: 5, 1, 32>}, {transform_indices = @transform_3, window_bounds = array<i64: 64, 32>}]} {
    %c0 = arith.constant 0 : index
    %c0_0 = arith.constant 0 : index
    %0 = vector.load %arg1[%c0, %c0_0] : memref<64x32xf32, #tpu.memory_space<vmem>>, vector<64x32xf32>
    %c0_1 = arith.constant 0 : index
    %c0_2 = arith.constant 0 : index
    %c0_3 = arith.constant 0 : index
    %1 = vector.load %arg2[%c0_1, %c0_2, %c0_3] : memref<5x32x32xf32, #tpu.memory_space<vmem>>, vector<1x32x32xf32>
    %2 = vector.shape_cast %1 : vector<1x32x32xf32> to vector<32x32xf32>
    %cst = arith.constant dense<0.000000e+00> : vector<64x32xf32>
    %3 = tpu.matmul %0, %2, %cst {dimension_numbers = #tpu.dot_dimension_numbers<[1], [0], [0], [1], [0, 0, 1, 1], [], []>} : vector<64x32xf32>, vector<32x32xf32>, vector<64x32xf32> -> vector<64x32xf32>
    %c0_4 = arith.constant 0 : index
    %c0_5 = arith.constant 0 : index
    %c0_6 = arith.constant 0 : index
    %4 = vector.load %arg3[%c0_4, %c0_5, %c0_6] : memref<5x1x32xf32, #tpu.memory_space<vmem>>, vector<1x1x32xf32>
    %5 = vector.shape_cast %4 : vector<1x1x32xf32> to vector<1x32xf32>
    %6 = vector.broadcast %5 : vector<1x32xf32> to vector<64x32xf32>
    %7 = arith.addf %3, %6 : vector<64x32xf32>
    %cst_7 = arith.constant 0.000000e+00 : f32
    %8 = vector.broadcast %cst_7 : f32 to vector<64x32xf32>
    %9 = arith.maximumf %7, %8 : vector<64x32xf32>
    %c1 = arith.constant 1 : index
    %c0_8 = arith.constant 0 : index
    %c0_9 = arith.constant 0 : index
    %10 = vector.load %arg2[%c1, %c0_8, %c0_9] : memref<5x32x32xf32, #tpu.memory_space<vmem>>, vector<1x32x32xf32>
    %11 = vector.shape_cast %10 : vector<1x32x32xf32> to vector<32x32xf32>
    %cst_10 = arith.constant dense<0.000000e+00> : vector<64x32xf32>
    %12 = tpu.matmul %9, %11, %cst_10 {dimension_numbers = #tpu.dot_dimension_numbers<[1], [0], [0], [1], [0, 0, 1, 1], [], []>} : vector<64x32xf32>, vector<32x32xf32>, vector<64x32xf32> -> vector<64x32xf32>
    %c1_11 = arith.constant 1 : index
    %c0_12 = arith.constant 0 : index
    %c0_13 = arith.constant 0 : index
    %13 = vector.load %arg3[%c1_11, %c0_12, %c0_13] : memref<5x1x32xf32, #tpu.memory_space<vmem>>, vector<1x1x32xf32>
    %14 = vector.shape_cast %13 : vector<1x1x32xf32> to vector<1x32xf32>
    %15 = vector.broadcast %14 : vector<1x32xf32> to vector<64x32xf32>
    %16 = arith.addf %12, %15 : vector<64x32xf32>
    %cst_14 = arith.constant 0.000000e+00 : f32
    %17 = vector.broadcast %cst_14 : f32 to vector<64x32xf32>
    %18 = arith.maximumf %16, %17 : vector<64x32xf32>
    %c2 = arith.constant 2 : index
    %c0_15 = arith.constant 0 : index
    %c0_16 = arith.constant 0 : index
    %19 = vector.load %arg2[%c2, %c0_15, %c0_16] : memref<5x32x32xf32, #tpu.memory_space<vmem>>, vector<1x32x32xf32>
    %20 = vector.shape_cast %19 : vector<1x32x32xf32> to vector<32x32xf32>
    %cst_17 = arith.constant dense<0.000000e+00> : vector<64x32xf32>
    %21 = tpu.matmul %18, %20, %cst_17 {dimension_numbers = #tpu.dot_dimension_numbers<[1], [0], [0], [1], [0, 0, 1, 1], [], []>} : vector<64x32xf32>, vector<32x32xf32>, vector<64x32xf32> -> vector<64x32xf32>
    %c2_18 = arith.constant 2 : index
    %c0_19 = arith.constant 0 : index
    %c0_20 = arith.constant 0 : index
    %22 = vector.load %arg3[%c2_18, %c0_19, %c0_20] : memref<5x1x32xf32, #tpu.memory_space<vmem>>, vector<1x1x32xf32>
    %23 = vector.shape_cast %22 : vector<1x1x32xf32> to vector<1x32xf32>
    %24 = vector.broadcast %23 : vector<1x32xf32> to vector<64x32xf32>
    %25 = arith.addf %21, %24 : vector<64x32xf32>
    %cst_21 = arith.constant 0.000000e+00 : f32
    %26 = vector.broadcast %cst_21 : f32 to vector<64x32xf32>
    %27 = arith.maximumf %25, %26 : vector<64x32xf32>
    %c3 = arith.constant 3 : index
    %c0_22 = arith.constant 0 : index
    %c0_23 = arith.constant 0 : index
    %28 = vector.load %arg2[%c3, %c0_22, %c0_23] : memref<5x32x32xf32, #tpu.memory_space<vmem>>, vector<1x32x32xf32>
    %29 = vector.shape_cast %28 : vector<1x32x32xf32> to vector<32x32xf32>
    %cst_24 = arith.constant dense<0.000000e+00> : vector<64x32xf32>
    %30 = tpu.matmul %27, %29, %cst_24 {dimension_numbers = #tpu.dot_dimension_numbers<[1], [0], [0], [1], [0, 0, 1, 1], [], []>} : vector<64x32xf32>, vector<32x32xf32>, vector<64x32xf32> -> vector<64x32xf32>
    %c3_25 = arith.constant 3 : index
    %c0_26 = arith.constant 0 : index
    %c0_27 = arith.constant 0 : index
    %31 = vector.load %arg3[%c3_25, %c0_26, %c0_27] : memref<5x1x32xf32, #tpu.memory_space<vmem>>, vector<1x1x32xf32>
    %32 = vector.shape_cast %31 : vector<1x1x32xf32> to vector<1x32xf32>
    %33 = vector.broadcast %32 : vector<1x32xf32> to vector<64x32xf32>
    %34 = arith.addf %30, %33 : vector<64x32xf32>
    %cst_28 = arith.constant 0.000000e+00 : f32
    %35 = vector.broadcast %cst_28 : f32 to vector<64x32xf32>
    %36 = arith.maximumf %34, %35 : vector<64x32xf32>
    %c4 = arith.constant 4 : index
    %c0_29 = arith.constant 0 : index
    %c0_30 = arith.constant 0 : index
    %37 = vector.load %arg2[%c4, %c0_29, %c0_30] : memref<5x32x32xf32, #tpu.memory_space<vmem>>, vector<1x32x32xf32>
    %38 = vector.shape_cast %37 : vector<1x32x32xf32> to vector<32x32xf32>
    %cst_31 = arith.constant dense<0.000000e+00> : vector<64x32xf32>
    %39 = tpu.matmul %36, %38, %cst_31 {dimension_numbers = #tpu.dot_dimension_numbers<[1], [0], [0], [1], [0, 0, 1, 1], [], []>} : vector<64x32xf32>, vector<32x32xf32>, vector<64x32xf32> -> vector<64x32xf32>
    %c4_32 = arith.constant 4 : index
    %c0_33 = arith.constant 0 : index
    %c0_34 = arith.constant 0 : index
    %40 = vector.load %arg3[%c4_32, %c0_33, %c0_34] : memref<5x1x32xf32, #tpu.memory_space<vmem>>, vector<1x1x32xf32>
    %41 = vector.shape_cast %40 : vector<1x1x32xf32> to vector<1x32xf32>
    %42 = vector.broadcast %41 : vector<1x32xf32> to vector<64x32xf32>
    %43 = arith.addf %39, %42 : vector<64x32xf32>
    %c0_35 = arith.constant 0 : index
    %c0_36 = arith.constant 0 : index
    %44 = vector.load %arg4[%c0_35, %c0_36] : memref<64x32xf32, #tpu.memory_space<vmem>>, vector<64x32xf32>
    tpu.vector_store %arg4[%c0_35, %c0_36], %43 {strides = array<i32>} : memref<64x32xf32, #tpu.memory_space<vmem>>, vector<64x32xf32>,
    return
  }
  func.func @transform_0(%arg0: i32) -> (i32, i32) {
    %c0_i32 = arith.constant 0 : i32
    %c0_i32_0 = arith.constant 0 : i32
    return %arg0, %c0_i32 : i32, i32
  }
  func.func @transform_1(%arg0: i32) -> (i32, i32, i32) {
    %c0_i32 = arith.constant 0 : i32
    %c0_i32_0 = arith.constant 0 : i32
    %c0_i32_1 = arith.constant 0 : i32
    %c0_i32_2 = arith.constant 0 : i32
    return %c0_i32, %c0_i32_0, %c0_i32_1 : i32, i32, i32
  }
  func.func @transform_2(%arg0: i32) -> (i32, i32, i32) {
    %c0_i32 = arith.constant 0 : i32
    %c0_i32_0 = arith.constant 0 : i32
    %c0_i32_1 = arith.constant 0 : i32
    %c0_i32_2 = arith.constant 0 : i32
    return %c0_i32, %c0_i32_0, %c0_i32_1 : i32, i32, i32
  }
  func.func @transform_3(%arg0: i32) -> (i32, i32) {
    %c0_i32 = arith.constant 0 : i32
    %c0_i32_0 = arith.constant 0 : i32
    return %arg0, %c0_i32 : i32, i32
  }
}

</mosaic_0001>

<bundles_post_ra>
// kernel: tpu_custom_call.1
= control target key start
LH: loop header
LB: loop body
LE: loop exit
PB: predicated region body
PF: predicated region fallthrough
CT: control target
= control target key end

     0   :  { %8 = vsyncpa [#allocation3], 0  ;;  %s1070_s12 = smov [#allocation2]   ;;  %s1216_s0 = inlined_call_operand.vmem [shape: f32[64,32], index: 0, kind: input, shape index: {}]   ;;  %s1217_s1 = inlined_call_operand.hbm [shape: f32[5,32,32], index: 1, kind: input, shape index: {}]   ;;  %s1218_s2 = inlined_call_operand.vmem [shape: f32[5,1,32], index: 2, kind: input, shape index: {}]   ;;  %s1219_s3 = inlined_call_operand.vmem [shape: f32[64,32], index: 3, kind: output, shape index: {}]  }
   0x1   :  { %s16_s13 = sshll.u32 %s1070_s12, 4  ;;  %s1046_s16 = scalar_lea.hbm %s1217_s1, 2560  ;;  %s17_s13 = int_to_ptr.vmem [resolvable:$true] %s16_s13 }
   0x2   :  { %p1047_p0 = scmp.ne.s32.totalorder %s1217_s1, %s1046_s16  ;;  %p1050_p1 = scmp.lt.u32.totalorder %s1046_s16, %s1217_s1 }
   0x4   :  { %p1052_p2 = pnand %p1050_p1, %p1047_p0 }
   0x6   :  { %1055 = shalt.err (!%p1052_p2)
}
   0x7   :  { %s1056_s21 = scalar_lea.vmem %s17_s13, 2560  ;;  %p1061_p4 = scmp.lt.s32.totalorder %s17_s13, %s17_s13 }
   0x8   :  { %p1057_p3 = scmp.ne.s32.totalorder %s17_s13, %s1056_s21  ;;  %p1062_p5 = scmp.lt.s32.totalorder %s1056_s21, %s1056_s21 }
   0xa   :  { %p1063_p6 = por %p1062_p5, %p1061_p4 }
   0xc   :  { %p1064_p7 = pnand %p1063_p6, %p1057_p3 }
   0xe   :  { %1067 = shalt.err (!%p1064_p7)
}
   0xf   :  { %s1071_s22 = smov 128   ;;  %s1072_s23 = smov 8  }
  0x10   :  { %22 = dma.hbm_to_vmem [thread:$0]  %s1217_s1, 2560, %s17_s13, [#allocation3], %s1071_s22, %s1071_s22, %s1072_s23  }
  0x11   :  { %1068 = dma.done.wait [#allocation3], 2560  }
  0x12   :  { %1069 = vsyncadd [#allocation3], 4294964736  ;;  %vm47_vm0 = vcmask 261120   ;;  %v36_v0 = vld [vmem:[#allocation2] sm:$0xff]  ;;  %v37_v1 = vld [vmem:[#allocation2 + $0x8] sm:$0xff] }
  0x13   :  { %v38_v2 = vld [vmem:[#allocation2 + $0x10] sm:$0xff]  ;;  %v999_v3 = vpack.c.bf16 %v37_v1, %v36_v0  ;;  %v39_v4 = vld [vmem:[#allocation2 + $0x18] sm:$0xff]  ;;  %v28_v5 = vld [vmem:[%s1216_s0] sm:$0xff] }
  0x14   :  { %v1003_v6 = vpack.c.bf16 %v39_v4, %v38_v2  ;;  %907 = vmatprep.mubr.msk.f32.mxu0 %vm47_vm0, %v28_v5  ;;  %v32_v7 = vld [vmem:[%s1216_s0 + $0x20] sm:$0xff]  ;;  %v187_v9 = vld [vmem:[#allocation2 + $0x28] sm:$0xff]  ;;  %v30_v13 = vld [vmem:[%s1216_s0 + $0x10] sm:$0xff] }
  0x15   :  { %1000 = vmatprep.subr.bf16.mxu0 %v999_v3  ;;  %1039 = vmatprep.subr.bf16.mxu1 %v999_v3  ;;  %v186_v8 = vld [vmem:[#allocation2 + $0x20] sm:$0xff]  ;;  %v29_v11 = vld [vmem:[%s1216_s0 + $0x8] sm:$0xff]  ;;  %v34_v14 = vld [vmem:[%s1216_s0 + $0x30] sm:$0xff] }
  0x16   :  { %1002 = vmatpush3.bf16.msra.mxu0 %v999_v3  ;;  %1041 = vmatpush3.bf16.msra.mxu1 %v999_v3  ;;  %v1007_v10 = vpack.c.bf16 %v187_v9, %v186_v8  ;;  %v33_v12 = vld [vmem:[%s1216_s0 + $0x28] sm:$0xff]  ;;  %v31_v15 = vld [vmem:[%s1216_s0 + $0x18] sm:$0xff]  ;;  %v188_v17 = vld [vmem:[#allocation2 + $0x30] sm:$0xff] }
  0x17   :  { %1004 = vmatprep.subr.bf16.mxu0 %v1003_v6  ;;  %1040 = vmatprep.subr.bf16.mxu1 %v1003_v6  ;;  %v35_v16 = vld [vmem:[%s1216_s0 + $0x38] sm:$0xff]  ;;  %v336_v20 = vld [vmem:[#allocation2 + $0x40] sm:$0xff]  ;;  %v337_v21 = vld [vmem:[#allocation2 + $0x48] sm:$0xff] }
  0x18   :  { %913 = vmatprep.mubr.msk.f32.mxu1 %vm47_vm0, %v32_v7  ;;  %v189_v18 = vld [vmem:[#allocation2 + $0x38] sm:$0xff]  ;;  %v1015_v22 = vpack.c.bf16 %v337_v21, %v336_v20  ;;  %v790_v23 = vld [vmem:[%s1218_s2] ss:$0 sm:$0xff]  ;;  %v338_v48 = vld [vmem:[#allocation2 + $0x50] sm:$0xff] }
  0x19   :  { %v1011_v19 = vpack.c.bf16 %v189_v18, %v188_v17  ;;  %v339_v49 = vld [vmem:[#allocation2 + $0x58] sm:$0xff]  ;;  %v486_v51 = vld [vmem:[#allocation2 + $0x60] sm:$0xff]  ;;  %v487_v52 = vld [vmem:[#allocation2 + $0x68] sm:$0xff] }
  0x1a   :  { %1006 = vmatpush3.bf16.msra.mxu0 %v1003_v6  ;;  %1042 = vmatpush3.bf16.msra.mxu1 %v1003_v6  ;;  %v1019_v50 = vpack.c.bf16 %v339_v49, %v338_v48  ;;  %v488_v53 = vld [vmem:[#allocation2 + $0x70] sm:$0xff]  ;;  %v1023_v54 = vpack.c.bf16 %v487_v52, %v486_v51  ;;  %v489_v55 = vld [vmem:[#allocation2 + $0x78] sm:$0xff]  ;;  %v800_v57 = vld [vmem:[%s1218_s2 + $0x1] ss:$0 sm:$0xff] }
  0x1b   :  { %1008 = vmatprep.subr.bf16.mxu1 %v1007_v10  ;;  %1016 = vmatprep.subr.bf16.mxu0 %v1015_v22  ;;  %v1027_v56 = vpack.c.bf16 %v489_v55, %v488_v53  ;;  %v636_v18 = vld [vmem:[#allocation2 + $0x80] sm:$0xff]  ;;  %v638_v20 = vld [vmem:[#allocation2 + $0x90] sm:$0xff] }
  0x1c   :  { %v820_v49 = vld [vmem:[%s1218_s2 + $0x3] ss:$0 sm:$0xff] }
  0x1d   :  { %908 = vmatmul.mubr.msk.f32.vlgmr.msra.gmra.mrb[0].mxu0 %vm47_vm0, %v29_v11  ;;  %914 = vmatmul.mubr.msk.f32.vlgmr.msra.gmra.mrb[0].mxu1 %vm47_vm0, %v33_v12 }
  0x1e   :  { %910 = vmatprep.mubr.msk.f32.mxu0 %vm47_vm0, %v30_v13  ;;  %916 = vmatprep.mubr.msk.f32.mxu1 %vm47_vm0, %v34_v14 }
  0x1f   :  { %1010 = vmatpush3.bf16.msra.mxu1 %v1007_v10  ;;  %1018 = vmatpush3.bf16.msra.mxu0 %v1015_v22  ;;  %v639_v22 = vld [vmem:[#allocation2 + $0x98] sm:$0xff] }
  0x20   :  { %1012 = vmatprep.subr.bf16.mxu1 %v1011_v19  ;;  %1020 = vmatprep.subr.bf16.mxu0 %v1019_v50 }
  0x21   :  { %911 = vmatmul.mubr.msk.f32.gmra.mrb[2].mxu0 %vm47_vm0, %v31_v15  ;;  %917 = vmatmul.mubr.msk.f32.gmra.mrb[2].mxu1 %vm47_vm0, %v35_v16 }
  0x23   :  { %1014 = vmatpush3.bf16.msra.mxu1 %v1011_v19  ;;  %1022 = vmatpush3.bf16.msra.mxu0 %v1019_v50  ;;  %v637_v19 = vld [vmem:[#allocation2 + $0x88] sm:$0xff] }
  0x24   :  { %1024 = vmatprep.subr.bf16.mxu1 %v1023_v54  ;;  %v1031_v21 = vpack.c.bf16 %v637_v19, %v636_v18 }
  0x26   :  { %1032 = vmatprep.subr.bf16.mxu0 %v1031_v21 }
  0xf0   :  { %v909_v24 = vpop.f32.mrb[0].mxu0  ;;  %v915_v25 = vpop.f32.mrb[0].mxu1 }
  0xf1   :  { %v144_v26 = vadd.f32 %v909_v24, %v790_v23  ;;  %v138_v27 = vpop.f32.mrb[1].mxu0  ;;  %v158_v28 = vpop.f32.mrb[1].mxu1  ;;  %v164_v43 = vadd.f32 %v915_v25, %v790_v23  ;;  %v810_v24 = vld [vmem:[%s1218_s2 + $0x2] ss:$0 sm:$0xff] }
  0xf2   :  { %v139_v29 = vadd.f32 %v790_v23, %v138_v27  ;;  %v159_v32 = vadd.f32 %v790_v23, %v158_v28 }
  0xf3   :  { %v178_v34 = vmax.f32 %v144_v26, 0.0  ;;  %v182_v45 = vmax.f32 %v164_v43, 0.0 }
  0xf4   :  { %v177_v30 = vmax.f32 %v139_v29, 0.0  ;;  %v912_v31 = vpop.f32.mrb[2].mxu0  ;;  %v918_v33 = vpop.f32.mrb[2].mxu1  ;;  %v181_v40 = vmax.f32 %v159_v32, 0.0 }
  0xf5   :  { %v154_v35 = vadd.f32 %v912_v31, %v790_v23  ;;  %v148_v36 = vpop.f32.mrb[3].mxu0  ;;  %v168_v37 = vpop.f32.mrb[3].mxu1  ;;  %v174_v46 = vadd.f32 %v918_v33, %v790_v23 }
  0xf6   :  { %v149_v38 = vadd.f32 %v790_v23, %v148_v36  ;;  %927 = vmatprep.mubr.msk.f32.mxu1 %vm47_vm0, %v177_v30  ;;  %v169_v41 = vadd.f32 %v790_v23, %v168_v37  ;;  %v1035_v23 = vpack.c.bf16 %v639_v22, %v638_v20 }
  0xf7   :  { %928 = vmatmul.mubr.msk.f32.vlgmr.msra.gmra.mrb[4].mxu1 %vm47_vm0, %v178_v34  ;;  %v180_v42 = vmax.f32 %v154_v35, 0.0  ;;  %v184_v47 = vmax.f32 %v174_v46, 0.0 }
  0xf8   :  { %v179_v39 = vmax.f32 %v149_v38, 0.0  ;;  %v183_v44 = vmax.f32 %v169_v41, 0.0  ;;  %1026 = vmatpush3.bf16.msra.mxu1 %v1023_v54 }
  0xf9   :  { %1028 = vmatprep.subr.bf16.mxu1 %v1027_v56 }
  0xfa   :  { %930 = vmatprep.mubr.msk.f32.mxu1 %vm47_vm0, %v179_v39 }
  0xfb   :  { %931 = vmatmul.mubr.msk.f32.gmra.mrb[6].mxu1 %vm47_vm0, %v180_v42 }
  0xfc   :  { %933 = vmatprep.mubr.msk.f32.mxu1 %vm47_vm0, %v181_v40  ;;  %1030 = vmatpush3.bf16.msra.mxu1 %v1027_v56 }
  0xff   :  { %934 = vmatmul.mubr.msk.f32.gmra.mrb[8].mxu1 %vm47_vm0, %v182_v45 }
 0x100   :  { %936 = vmatprep.mubr.msk.f32.mxu1 %vm47_vm0, %v183_v44 }
 0x103   :  { %937 = vmatmul.mubr.msk.f32.gmra.mrb[10].mxu1 %vm47_vm0, %v184_v47 }
 0x1ca   :  { %v929_v58 = vpop.f32.mrb[4].mxu1 }
 0x1cb   :  { %v294_v59 = vadd.f32 %v929_v58, %v800_v57  ;;  %v288_v60 = vpop.f32.mrb[5].mxu1 }
 0x1cc   :  { %v289_v61 = vadd.f32 %v800_v57, %v288_v60 }
 0x1cd   :  { %v328_v0 = vmax.f32 %v294_v59, 0.0 }
 0x1ce   :  { %v327_v62 = vmax.f32 %v289_v61, 0.0  ;;  %v932_v63 = vpop.f32.mrb[6].mxu1 }
 0x1cf   :  { %v304_v1 = vadd.f32 %v932_v63, %v800_v57  ;;  %v298_v2 = vpop.f32.mrb[7].mxu1 }
 0x1d0   :  { %v299_v3 = vadd.f32 %v800_v57, %v298_v2  ;;  %947 = vmatprep.mubr.msk.f32.mxu0 %vm47_vm0, %v327_v62 }
 0x1d1   :  { %948 = vmatmul.mubr.msk.f32.vlgmr.msra.gmra.mrb[4].mxu0 %vm47_vm0, %v328_v0  ;;  %v330_v6 = vmax.f32 %v304_v1, 0.0 }
 0x1d2   :  { %v329_v4 = vmax.f32 %v299_v3, 0.0  ;;  %v935_v5 = vpop.f32.mrb[8].mxu1  ;;  %1034 = vmatpush3.bf16.msra.mxu0 %v1031_v21 }
 0x1d3   :  { %v314_v7 = vadd.f32 %v935_v5, %v800_v57  ;;  %v308_v8 = vpop.f32.mrb[9].mxu1  ;;  %1036 = vmatprep.subr.bf16.mxu0 %v1035_v23 }
 0x1d4   :  { %v309_v9 = vadd.f32 %v800_v57, %v308_v8  ;;  %950 = vmatprep.mubr.msk.f32.mxu0 %vm47_vm0, %v329_v4 }
 0x1d5   :  { %951 = vmatmul.mubr.msk.f32.gmra.mrb[6].mxu0 %vm47_vm0, %v330_v6  ;;  %v332_v12 = vmax.f32 %v314_v7, 0.0 }
 0x1d6   :  { %v331_v10 = vmax.f32 %v309_v9, 0.0  ;;  %v938_v11 = vpop.f32.mrb[10].mxu1  ;;  %1038 = vmatpush3.bf16.msra.mxu0 %v1035_v23 }
 0x1d7   :  { %v324_v13 = vadd.f32 %v938_v11, %v800_v57  ;;  %v318_v14 = vpop.f32.mrb[11].mxu1 }
 0x1d8   :  { %v319_v15 = vadd.f32 %v800_v57, %v318_v14  ;;  %953 = vmatprep.mubr.msk.f32.mxu0 %vm47_vm0, %v331_v10  ;;  %v830_v10 = vld [vmem:[%s1218_s2 + $0x4] ss:$0 sm:$0xff] }
 0x1d9   :  { %954 = vmatmul.mubr.msk.f32.gmra.mrb[8].mxu0 %vm47_vm0, %v332_v12  ;;  %v334_v17 = vmax.f32 %v324_v13, 0.0 }
 0x1da   :  { %v333_v16 = vmax.f32 %v319_v15, 0.0 }
 0x1dc   :  { %956 = vmatprep.mubr.msk.f32.mxu0 %vm47_vm0, %v333_v16 }
 0x1dd   :  { %957 = vmatmul.mubr.msk.f32.gmra.mrb[10].mxu0 %vm47_vm0, %v334_v17 }
 0x2a4   :  { %v949_v25 = vpop.f32.mrb[4].mxu0 }
 0x2a5   :  { %v444_v26 = vadd.f32 %v949_v25, %v810_v24  ;;  %v438_v27 = vpop.f32.mrb[5].mxu0 }
 0x2a6   :  { %v439_v28 = vadd.f32 %v810_v24, %v438_v27 }
 0x2a7   :  { %v478_v31 = vmax.f32 %v444_v26, 0.0 }
 0x2a8   :  { %v477_v29 = vmax.f32 %v439_v28, 0.0  ;;  %v952_v30 = vpop.f32.mrb[6].mxu0 }
 0x2a9   :  { %v454_v32 = vadd.f32 %v952_v30, %v810_v24  ;;  %v448_v33 = vpop.f32.mrb[7].mxu0 }
 0x2aa   :  { %v449_v34 = vadd.f32 %v810_v24, %v448_v33  ;;  %967 = vmatprep.mubr.msk.f32.mxu1 %vm47_vm0, %v477_v29 }
 0x2ab   :  { %968 = vmatmul.mubr.msk.f32.vlgmr.msra.gmra.mrb[12].mxu1 %vm47_vm0, %v478_v31  ;;  %v480_v37 = vmax.f32 %v454_v32, 0.0 }
 0x2ac   :  { %v479_v35 = vmax.f32 %v449_v34, 0.0  ;;  %v955_v36 = vpop.f32.mrb[8].mxu0 }
 0x2ad   :  { %v464_v38 = vadd.f32 %v955_v36, %v810_v24  ;;  %v458_v39 = vpop.f32.mrb[9].mxu0 }
 0x2ae   :  { %v459_v40 = vadd.f32 %v810_v24, %v458_v39  ;;  %970 = vmatprep.mubr.msk.f32.mxu1 %vm47_vm0, %v479_v35 }
 0x2af   :  { %971 = vmatmul.mubr.msk.f32.gmra.mrb[14].mxu1 %vm47_vm0, %v480_v37  ;;  %v482_v43 = vmax.f32 %v464_v38, 0.0 }
 0x2b0   :  { %v481_v41 = vmax.f32 %v459_v40, 0.0  ;;  %v958_v42 = vpop.f32.mrb[10].mxu0 }
 0x2b1   :  { %v474_v44 = vadd.f32 %v958_v42, %v810_v24  ;;  %v468_v45 = vpop.f32.mrb[11].mxu0 }
 0x2b2   :  { %v469_v46 = vadd.f32 %v810_v24, %v468_v45  ;;  %973 = vmatprep.mubr.msk.f32.mxu1 %vm47_vm0, %v481_v41 }
 0x2b3   :  { %974 = vmatmul.mubr.msk.f32.gmra.mrb[16].mxu1 %vm47_vm0, %v482_v43  ;;  %v484_v48 = vmax.f32 %v474_v44, 0.0 }
 0x2b4   :  { %v483_v47 = vmax.f32 %v469_v46, 0.0 }
 0x2b6   :  { %976 = vmatprep.mubr.msk.f32.mxu1 %vm47_vm0, %v483_v47 }
 0x2b7   :  { %977 = vmatmul.mubr.msk.f32.gmra.mrb[18].mxu1 %vm47_vm0, %v484_v48 }
 0x37e   :  { %v969_v50 = vpop.f32.mrb[12].mxu1 }
 0x37f   :  { %v594_v51 = vadd.f32 %v969_v50, %v820_v49  ;;  %v588_v52 = vpop.f32.mrb[13].mxu1 }
 0x380   :  { %v589_v53 = vadd.f32 %v820_v49, %v588_v52 }
 0x381   :  { %v628_v56 = vmax.f32 %v594_v51, 0.0 }
 0x382   :  { %v627_v54 = vmax.f32 %v589_v53, 0.0  ;;  %v972_v55 = vpop.f32.mrb[14].mxu1 }
 0x383   :  { %v604_v57 = vadd.f32 %v972_v55, %v820_v49  ;;  %v598_v58 = vpop.f32.mrb[15].mxu1 }
 0x384   :  { %v599_v59 = vadd.f32 %v820_v49, %v598_v58  ;;  %987 = vmatprep.mubr.msk.f32.mxu0 %vm47_vm0, %v627_v54 }
 0x385   :  { %988 = vmatmul.mubr.msk.f32.vlgmr.msra.gmra.mrb[12].mxu0 %vm47_vm0, %v628_v56  ;;  %v630_v62 = vmax.f32 %v604_v57, 0.0 }
 0x386   :  { %v629_v60 = vmax.f32 %v599_v59, 0.0  ;;  %v975_v61 = vpop.f32.mrb[16].mxu1 }
 0x387   :  { %v614_v63 = vadd.f32 %v975_v61, %v820_v49  ;;  %v608_v0 = vpop.f32.mrb[17].mxu1 }
 0x388   :  { %v609_v1 = vadd.f32 %v820_v49, %v608_v0  ;;  %990 = vmatprep.mubr.msk.f32.mxu0 %vm47_vm0, %v629_v60 }
 0x389   :  { %991 = vmatmul.mubr.msk.f32.gmra.mrb[14].mxu0 %vm47_vm0, %v630_v62  ;;  %v632_v4 = vmax.f32 %v614_v63, 0.0 }
 0x38a   :  { %v631_v2 = vmax.f32 %v609_v1, 0.0  ;;  %v978_v3 = vpop.f32.mrb[18].mxu1 }
 0x38b   :  { %v624_v5 = vadd.f32 %v978_v3, %v820_v49  ;;  %v618_v6 = vpop.f32.mrb[19].mxu1 }
 0x38c   :  { %v619_v7 = vadd.f32 %v820_v49, %v618_v6  ;;  %993 = vmatprep.mubr.msk.f32.mxu0 %vm47_vm0, %v631_v2 }
 0x38d   :  { %994 = vmatmul.mubr.msk.f32.gmra.mrb[16].mxu0 %vm47_vm0, %v632_v4  ;;  %v634_v9 = vmax.f32 %v624_v5, 0.0 }
 0x38e   :  { %v633_v8 = vmax.f32 %v619_v7, 0.0 }
 0x390   :  { %996 = vmatprep.mubr.msk.f32.mxu0 %vm47_vm0, %v633_v8 }
 0x391   :  { %997 = vmatmul.mubr.msk.f32.gmra.mrb[18].mxu0 %vm47_vm0, %v634_v9 }
 0x458   :  { %v989_v11 = vpop.f32.mrb[12].mxu0 }
 0x459   :  { %v744_v12 = vadd.f32 %v989_v11, %v830_v10  ;;  %v738_v13 = vpop.f32.mrb[13].mxu0 }
 0x45a   :  { %v739_v14 = vadd.f32 %v830_v10, %v738_v13 }
 0x45b   :  { %778 = vst.msk [vmem:[%s1219_s3 + $0x8] sm:$0xff] %vm47_vm0, %v744_v12 }
 0x45c   :  { %777 = vst.msk [vmem:[%s1219_s3] sm:$0xff] %vm47_vm0, %v739_v14  ;;  %v992_v15 = vpop.f32.mrb[14].mxu0 }
 0x45d   :  { %v754_v16 = vadd.f32 %v992_v15, %v830_v10  ;;  %v748_v17 = vpop.f32.mrb[15].mxu0 }
 0x45e   :  { %v749_v18 = vadd.f32 %v830_v10, %v748_v17 }
 0x45f   :  { %780 = vst.msk [vmem:[%s1219_s3 + $0x18] sm:$0xff] %vm47_vm0, %v754_v16 }
 0x460   :  { %779 = vst.msk [vmem:[%s1219_s3 + $0x10] sm:$0xff] %vm47_vm0, %v749_v18  ;;  %v995_v19 = vpop.f32.mrb[16].mxu0 }
 0x461   :  { %v764_v20 = vadd.f32 %v995_v19, %v830_v10  ;;  %v758_v21 = vpop.f32.mrb[17].mxu0 }
 0x462   :  { %v759_v22 = vadd.f32 %v830_v10, %v758_v21 }
 0x463   :  { %782 = vst.msk [vmem:[%s1219_s3 + $0x28] sm:$0xff] %vm47_vm0, %v764_v20 }
 0x464   :  { %781 = vst.msk [vmem:[%s1219_s3 + $0x20] sm:$0xff] %vm47_vm0, %v759_v22  ;;  %v998_v23 = vpop.f32.mrb[18].mxu0 }
 0x465   :  { %v774_v24 = vadd.f32 %v998_v23, %v830_v10  ;;  %v768_v25 = vpop.f32.mrb[19].mxu0 }
 0x466   :  { %v769_v26 = vadd.f32 %v830_v10, %v768_v25 }
 0x467   :  { %784 = vst.msk [vmem:[%s1219_s3 + $0x38] sm:$0xff] %vm47_vm0, %v774_v24 }
 0x468   :  { %783 = vst.msk [vmem:[%s1219_s3 + $0x30] sm:$0xff] %vm47_vm0, %v769_v26 }
 0x469   :  { %789 = vsyncpa [#allocation3], 1 }

</bundles_post_ra>
